<compile_context>
chip_gen: v6e
topology: v6e:2x2x1
jax: 0.10.0
libtpu: 0.0.40
codegen_flags: <defaults>
</compile_context>

<pallas_src>
import jax
import jax.numpy as jnp
from jax.experimental import pallas as pl
from jax.experimental.pallas import tpu as pltpu

LANES = 128          # vreg lane width: last dim of every tile
HIDDEN = 15          # hidden width of the MLP


def _cdiv(a, b):
    return -(-a // b)


def _round_up(a, b):
    return _cdiv(a, b) * b


def _pairwise_sum(vals):
    """Depth-log2 tree sum of a list of arrays (shortens the add critical path)."""
    vals = list(vals)
    while len(vals) > 1:
        nxt = [vals[i] + vals[i + 1] for i in range(0, len(vals) - 1, 2)]
        if len(vals) % 2:
            nxt.append(vals[-1])
        vals = nxt
    return vals[0]


def mlp_kernel(a1_ref, c1_ref, a2_ref, bias_ref, x_ref, o_ref):
    # a1_ref, c1_ref, a2_ref: (15,) f32 in SMEM; bias_ref: (1,) f32 in SMEM.
    # x_ref / o_ref: (TB, 128) f32 lane-dense tiles of the flattened batch.
    x = x_ref[...]                                        # (TB, 128) f32
    # 15 independent tanh terms (1 EUP op each) summed with a pairwise tree.
    terms = [a2_ref[j] * jnp.tanh(a1_ref[j] * x + c1_ref[j]) for j in range(HIDDEN)]
    o_ref[...] = _pairwise_sum(terms) + bias_ref[0]


def _tiling(n_elems, tile_rows):
    """Balanced (n_tiles, tb, rows) for a lane-dense (rows, 128) slab."""
    rows_needed = max(1, _cdiv(n_elems, LANES))
    # Prefer >= 2 grid steps when there is enough work: shards across v7x's two
    # TensorCores and keeps the DMA/compute pipeline busy; near-free elsewhere.
    min_tiles = 2 if rows_needed >= 16 else 1
    n_tiles = max(_cdiv(rows_needed, tile_rows), min_tiles)
    tb = _round_up(_cdiv(rows_needed, n_tiles), 8)        # sublane-aligned height
    rows = n_tiles * tb                                   # grid divides exactly
    return n_tiles, tb, rows


def net_forward(x, w1, b1, w2, b2, *, tile_rows=2048):
    """x: (N, 1) f32;  w1: (15, 1), b1: (15,), w2: (1, 15), b2: (1,)  (PyTorch shapes)."""
    N = x.shape[0]
    n_tiles, tb, rows = _tiling(N, tile_rows)
    total = rows * LANES

    # Folded tanh parameterization: sigmoid(z) = 0.5 + 0.5 * tanh(z / 2)
    #   y = bias + sum_j a2_j * tanh(a1_j * x + c1_j)
    w1f = w1.reshape(-1).astype(jnp.float32)              # (15,)
    b1f = b1.reshape(-1).astype(jnp.float32)              # (15,)
    w2f = w2.reshape(-1).astype(jnp.float32)              # (15,)
    b2f = b2.reshape(-1).astype(jnp.float32)              # (1,)
    a1 = 0.5 * w1f
    c1 = 0.5 * b1f
    a2 = 0.5 * w2f
    bias = b2f + 0.5 * jnp.sum(w2f)                       # (1,)

    # Lane-dense layout: flatten the batch into a (rows, 128) slab, padding
    # only when the shapes require it (padded tail computes tanh of zeros and
    # is dropped below).
    x_flat = x.reshape(-1).astype(jnp.float32)
    if total != N:
        x_flat = jnp.pad(x_flat, (0, total - N))
    x_slab = x_flat.reshape(rows, LANES)

    out_slab = pl.pallas_call(
        mlp_kernel,
        out_shape=jax.ShapeDtypeStruct((rows, LANES), jnp.float32),
        grid_spec=pltpu.PrefetchScalarGridSpec(
            num_scalar_prefetch=0,
            grid=(n_tiles,),
            in_specs=[
                pl.BlockSpec(memory_space=pltpu.MemorySpace.SMEM),   # a1
                pl.BlockSpec(memory_space=pltpu.MemorySpace.SMEM),   # c1
                pl.BlockSpec(memory_space=pltpu.MemorySpace.SMEM),   # a2
                pl.BlockSpec(memory_space=pltpu.MemorySpace.SMEM),   # bias
                pl.BlockSpec((tb, LANES), lambda i: (i, 0)),         # x tile
            ],
            out_specs=pl.BlockSpec((tb, LANES), lambda i: (i, 0)),
        ),
        compiler_params=pltpu.CompilerParams(
            dimension_semantics=("parallel",),   # batch axis shards across TCs on v7x
        ),
    )(a1, c1, a2, bias, x_slab)

    # Un-pad and restore the (N, 1) PyTorch output shape.
    out = out_slab.reshape(total)
    if total != N:
        out = out[:N]
    return out.reshape(N, 1)


def init_params(key):
    """Deterministic init mimicking PyTorch Linear default (U[-1/sqrt(fan_in), 1/sqrt(fan_in)])."""
    k1, k2, k3, k4 = jax.random.split(key, 4)
    bound1 = 1.0 / jnp.sqrt(1.0)      # fan_in = 1
    bound2 = 1.0 / jnp.sqrt(15.0)     # fan_in = 15
    w1 = jax.random.uniform(k1, (HIDDEN, 1), jnp.float32, -bound1, bound1)
    b1 = jax.random.uniform(k2, (HIDDEN,), jnp.float32, -bound1, bound1)
    w2 = jax.random.uniform(k3, (1, HIDDEN), jnp.float32, -bound2, bound2)
    b2 = jax.random.uniform(k4, (1,), jnp.float32, -bound2, bound2)
    return w1, b1, w2, b2


if __name__ == "__main__":
    key = jax.random.PRNGKey(0)
    kx, kp = jax.random.split(key)

    N = 300                                            # ragged: not a multiple of 128
    x = jax.random.normal(kx, (N, 1), jnp.float32)     # (batch, in_features=1)
    w1, b1, w2, b2 = init_params(kp)

    fwd = jax.jit(net_forward)                         # pad/reshape/slice compile with the call
    y = jax.block_until_ready(fwd(x, w1, b1, w2, b2))

    # Reference check in plain JAX (same math as the PyTorch module, exact sigmoid).
    ref = jax.nn.sigmoid(x @ w1.T + b1) @ w2.T + b2
    assert y.shape == (N, 1)
    assert jnp.allclose(y, ref, atol=1e-5, rtol=1e-5)

    print("KERNEL_OK")
</pallas_src>

<mosaic_0001>
module attributes {stable_mosaic.version = 11 : i64} {
  func.func @mlp_kernel(%arg0: i32, %arg1: memref<15xf32, #tpu.memory_space<smem>>, %arg2: memref<15xf32, #tpu.memory_space<smem>>, %arg3: memref<15xf32, #tpu.memory_space<smem>>, %arg4: memref<1xf32, #tpu.memory_space<smem>>, %arg5: memref<8x128xf32, #tpu.memory_space<vmem>>, %arg6: memref<8x128xf32, #tpu.memory_space<vmem>>) attributes {dimension_semantics = [#tpu.dimension_semantics<parallel>], iteration_bounds = array<i64: 1>, scalar_prefetch = 0 : i64, scratch_operands = 0 : i64, tpu.core_type = #tpu.core_type<tc>, window_params = [{transform_indices = @transform_0, window_bounds = array<i64: 15>}, {transform_indices = @transform_1, window_bounds = array<i64: 15>}, {transform_indices = @transform_2, window_bounds = array<i64: 15>}, {transform_indices = @transform_3, window_bounds = array<i64: 1>}, {transform_indices = @transform_4, window_bounds = array<i64: 8, 128>}, {transform_indices = @transform_5, window_bounds = array<i64: 8, 128>}]} {
    %c0 = arith.constant 0 : index
    %c0_0 = arith.constant 0 : index
    %0 = vector.load %arg5[%c0, %c0_0] : memref<8x128xf32, #tpu.memory_space<vmem>>, vector<8x128xf32>
    %c0_1 = arith.constant 0 : index
    %1 = memref.load %arg3[%c0_1] : memref<15xf32, #tpu.memory_space<smem>>
    %c0_2 = arith.constant 0 : index
    %2 = memref.load %arg1[%c0_2] : memref<15xf32, #tpu.memory_space<smem>>
    %3 = vector.broadcast %2 : f32 to vector<8x128xf32>
    %4 = arith.mulf %3, %0 : vector<8x128xf32>
    %c0_3 = arith.constant 0 : index
    %5 = memref.load %arg2[%c0_3] : memref<15xf32, #tpu.memory_space<smem>>
    %6 = vector.broadcast %5 : f32 to vector<8x128xf32>
    %7 = arith.addf %4, %6 : vector<8x128xf32>
    %8 = math.tanh %7 : vector<8x128xf32>
    %9 = vector.broadcast %1 : f32 to vector<8x128xf32>
    %10 = arith.mulf %9, %8 : vector<8x128xf32>
    %c1 = arith.constant 1 : index
    %11 = memref.load %arg3[%c1] : memref<15xf32, #tpu.memory_space<smem>>
    %c1_4 = arith.constant 1 : index
    %12 = memref.load %arg1[%c1_4] : memref<15xf32, #tpu.memory_space<smem>>
    %13 = vector.broadcast %12 : f32 to vector<8x128xf32>
    %14 = arith.mulf %13, %0 : vector<8x128xf32>
    %c1_5 = arith.constant 1 : index
    %15 = memref.load %arg2[%c1_5] : memref<15xf32, #tpu.memory_space<smem>>
    %16 = vector.broadcast %15 : f32 to vector<8x128xf32>
    %17 = arith.addf %14, %16 : vector<8x128xf32>
    %18 = math.tanh %17 : vector<8x128xf32>
    %19 = vector.broadcast %11 : f32 to vector<8x128xf32>
    %20 = arith.mulf %19, %18 : vector<8x128xf32>
    %c2 = arith.constant 2 : index
    %21 = memref.load %arg3[%c2] : memref<15xf32, #tpu.memory_space<smem>>
    %c2_6 = arith.constant 2 : index
    %22 = memref.load %arg1[%c2_6] : memref<15xf32, #tpu.memory_space<smem>>
    %23 = vector.broadcast %22 : f32 to vector<8x128xf32>
    %24 = arith.mulf %23, %0 : vector<8x128xf32>
    %c2_7 = arith.constant 2 : index
    %25 = memref.load %arg2[%c2_7] : memref<15xf32, #tpu.memory_space<smem>>
    %26 = vector.broadcast %25 : f32 to vector<8x128xf32>
    %27 = arith.addf %24, %26 : vector<8x128xf32>
    %28 = math.tanh %27 : vector<8x128xf32>
    %29 = vector.broadcast %21 : f32 to vector<8x128xf32>
    %30 = arith.mulf %29, %28 : vector<8x128xf32>
    %c3 = arith.constant 3 : index
    %31 = memref.load %arg3[%c3] : memref<15xf32, #tpu.memory_space<smem>>
    %c3_8 = arith.constant 3 : index
    %32 = memref.load %arg1[%c3_8] : memref<15xf32, #tpu.memory_space<smem>>
    %33 = vector.broadcast %32 : f32 to vector<8x128xf32>
    %34 = arith.mulf %33, %0 : vector<8x128xf32>
    %c3_9 = arith.constant 3 : index
    %35 = memref.load %arg2[%c3_9] : memref<15xf32, #tpu.memory_space<smem>>
    %36 = vector.broadcast %35 : f32 to vector<8x128xf32>
    %37 = arith.addf %34, %36 : vector<8x128xf32>
    %38 = math.tanh %37 : vector<8x128xf32>
    %39 = vector.broadcast %31 : f32 to vector<8x128xf32>
    %40 = arith.mulf %39, %38 : vector<8x128xf32>
    %c4 = arith.constant 4 : index
    %41 = memref.load %arg3[%c4] : memref<15xf32, #tpu.memory_space<smem>>
    %c4_10 = arith.constant 4 : index
    %42 = memref.load %arg1[%c4_10] : memref<15xf32, #tpu.memory_space<smem>>
    %43 = vector.broadcast %42 : f32 to vector<8x128xf32>
    %44 = arith.mulf %43, %0 : vector<8x128xf32>
    %c4_11 = arith.constant 4 : index
    %45 = memref.load %arg2[%c4_11] : memref<15xf32, #tpu.memory_space<smem>>
    %46 = vector.broadcast %45 : f32 to vector<8x128xf32>
    %47 = arith.addf %44, %46 : vector<8x128xf32>
    %48 = math.tanh %47 : vector<8x128xf32>
    %49 = vector.broadcast %41 : f32 to vector<8x128xf32>
    %50 = arith.mulf %49, %48 : vector<8x128xf32>
    %c5 = arith.constant 5 : index
    %51 = memref.load %arg3[%c5] : memref<15xf32, #tpu.memory_space<smem>>
    %c5_12 = arith.constant 5 : index
    %52 = memref.load %arg1[%c5_12] : memref<15xf32, #tpu.memory_space<smem>>
    %53 = vector.broadcast %52 : f32 to vector<8x128xf32>
    %54 = arith.mulf %53, %0 : vector<8x128xf32>
    %c5_13 = arith.constant 5 : index
    %55 = memref.load %arg2[%c5_13] : memref<15xf32, #tpu.memory_space<smem>>
    %56 = vector.broadcast %55 : f32 to vector<8x128xf32>
    %57 = arith.addf %54, %56 : vector<8x128xf32>
    %58 = math.tanh %57 : vector<8x128xf32>
    %59 = vector.broadcast %51 : f32 to vector<8x128xf32>
    %60 = arith.mulf %59, %58 : vector<8x128xf32>
    %c6 = arith.constant 6 : index
    %61 = memref.load %arg3[%c6] : memref<15xf32, #tpu.memory_space<smem>>
    %c6_14 = arith.constant 6 : index
    %62 = memref.load %arg1[%c6_14] : memref<15xf32, #tpu.memory_space<smem>>
    %63 = vector.broadcast %62 : f32 to vector<8x128xf32>
    %64 = arith.mulf %63, %0 : vector<8x128xf32>
    %c6_15 = arith.constant 6 : index
    %65 = memref.load %arg2[%c6_15] : memref<15xf32, #tpu.memory_space<smem>>
    %66 = vector.broadcast %65 : f32 to vector<8x128xf32>
    %67 = arith.addf %64, %66 : vector<8x128xf32>
    %68 = math.tanh %67 : vector<8x128xf32>
    %69 = vector.broadcast %61 : f32 to vector<8x128xf32>
    %70 = arith.mulf %69, %68 : vector<8x128xf32>
    %c7 = arith.constant 7 : index
    %71 = memref.load %arg3[%c7] : memref<15xf32, #tpu.memory_space<smem>>
    %c7_16 = arith.constant 7 : index
    %72 = memref.load %arg1[%c7_16] : memref<15xf32, #tpu.memory_space<smem>>
    %73 = vector.broadcast %72 : f32 to vector<8x128xf32>
    %74 = arith.mulf %73, %0 : vector<8x128xf32>
    %c7_17 = arith.constant 7 : index
    %75 = memref.load %arg2[%c7_17] : memref<15xf32, #tpu.memory_space<smem>>
    %76 = vector.broadcast %75 : f32 to vector<8x128xf32>
    %77 = arith.addf %74, %76 : vector<8x128xf32>
    %78 = math.tanh %77 : vector<8x128xf32>
    %79 = vector.broadcast %71 : f32 to vector<8x128xf32>
    %80 = arith.mulf %79, %78 : vector<8x128xf32>
    %c8 = arith.constant 8 : index
    %81 = memref.load %arg3[%c8] : memref<15xf32, #tpu.memory_space<smem>>
    %c8_18 = arith.constant 8 : index
    %82 = memref.load %arg1[%c8_18] : memref<15xf32, #tpu.memory_space<smem>>
    %83 = vector.broadcast %82 : f32 to vector<8x128xf32>
    %84 = arith.mulf %83, %0 : vector<8x128xf32>
    %c8_19 = arith.constant 8 : index
    %85 = memref.load %arg2[%c8_19] : memref<15xf32, #tpu.memory_space<smem>>
    %86 = vector.broadcast %85 : f32 to vector<8x128xf32>
    %87 = arith.addf %84, %86 : vector<8x128xf32>
    %88 = math.tanh %87 : vector<8x128xf32>
    %89 = vector.broadcast %81 : f32 to vector<8x128xf32>
    %90 = arith.mulf %89, %88 : vector<8x128xf32>
    %c9 = arith.constant 9 : index
    %91 = memref.load %arg3[%c9] : memref<15xf32, #tpu.memory_space<smem>>
    %c9_20 = arith.constant 9 : index
    %92 = memref.load %arg1[%c9_20] : memref<15xf32, #tpu.memory_space<smem>>
    %93 = vector.broadcast %92 : f32 to vector<8x128xf32>
    %94 = arith.mulf %93, %0 : vector<8x128xf32>
    %c9_21 = arith.constant 9 : index
    %95 = memref.load %arg2[%c9_21] : memref<15xf32, #tpu.memory_space<smem>>
    %96 = vector.broadcast %95 : f32 to vector<8x128xf32>
    %97 = arith.addf %94, %96 : vector<8x128xf32>
    %98 = math.tanh %97 : vector<8x128xf32>
    %99 = vector.broadcast %91 : f32 to vector<8x128xf32>
    %100 = arith.mulf %99, %98 : vector<8x128xf32>
    %c10 = arith.constant 10 : index
    %101 = memref.load %arg3[%c10] : memref<15xf32, #tpu.memory_space<smem>>
    %c10_22 = arith.constant 10 : index
    %102 = memref.load %arg1[%c10_22] : memref<15xf32, #tpu.memory_space<smem>>
    %103 = vector.broadcast %102 : f32 to vector<8x128xf32>
    %104 = arith.mulf %103, %0 : vector<8x128xf32>
    %c10_23 = arith.constant 10 : index
    %105 = memref.load %arg2[%c10_23] : memref<15xf32, #tpu.memory_space<smem>>
    %106 = vector.broadcast %105 : f32 to vector<8x128xf32>
    %107 = arith.addf %104, %106 : vector<8x128xf32>
    %108 = math.tanh %107 : vector<8x128xf32>
    %109 = vector.broadcast %101 : f32 to vector<8x128xf32>
    %110 = arith.mulf %109, %108 : vector<8x128xf32>
    %c11 = arith.constant 11 : index
    %111 = memref.load %arg3[%c11] : memref<15xf32, #tpu.memory_space<smem>>
    %c11_24 = arith.constant 11 : index
    %112 = memref.load %arg1[%c11_24] : memref<15xf32, #tpu.memory_space<smem>>
    %113 = vector.broadcast %112 : f32 to vector<8x128xf32>
    %114 = arith.mulf %113, %0 : vector<8x128xf32>
    %c11_25 = arith.constant 11 : index
    %115 = memref.load %arg2[%c11_25] : memref<15xf32, #tpu.memory_space<smem>>
    %116 = vector.broadcast %115 : f32 to vector<8x128xf32>
    %117 = arith.addf %114, %116 : vector<8x128xf32>
    %118 = math.tanh %117 : vector<8x128xf32>
    %119 = vector.broadcast %111 : f32 to vector<8x128xf32>
    %120 = arith.mulf %119, %118 : vector<8x128xf32>
    %c12 = arith.constant 12 : index
    %121 = memref.load %arg3[%c12] : memref<15xf32, #tpu.memory_space<smem>>
    %c12_26 = arith.constant 12 : index
    %122 = memref.load %arg1[%c12_26] : memref<15xf32, #tpu.memory_space<smem>>
    %123 = vector.broadcast %122 : f32 to vector<8x128xf32>
    %124 = arith.mulf %123, %0 : vector<8x128xf32>
    %c12_27 = arith.constant 12 : index
    %125 = memref.load %arg2[%c12_27] : memref<15xf32, #tpu.memory_space<smem>>
    %126 = vector.broadcast %125 : f32 to vector<8x128xf32>
    %127 = arith.addf %124, %126 : vector<8x128xf32>
    %128 = math.tanh %127 : vector<8x128xf32>
    %129 = vector.broadcast %121 : f32 to vector<8x128xf32>
    %130 = arith.mulf %129, %128 : vector<8x128xf32>
    %c13 = arith.constant 13 : index
    %131 = memref.load %arg3[%c13] : memref<15xf32, #tpu.memory_space<smem>>
    %c13_28 = arith.constant 13 : index
    %132 = memref.load %arg1[%c13_28] : memref<15xf32, #tpu.memory_space<smem>>
    %133 = vector.broadcast %132 : f32 to vector<8x128xf32>
    %134 = arith.mulf %133, %0 : vector<8x128xf32>
    %c13_29 = arith.constant 13 : index
    %135 = memref.load %arg2[%c13_29] : memref<15xf32, #tpu.memory_space<smem>>
    %136 = vector.broadcast %135 : f32 to vector<8x128xf32>
    %137 = arith.addf %134, %136 : vector<8x128xf32>
    %138 = math.tanh %137 : vector<8x128xf32>
    %139 = vector.broadcast %131 : f32 to vector<8x128xf32>
    %140 = arith.mulf %139, %138 : vector<8x128xf32>
    %c14 = arith.constant 14 : index
    %141 = memref.load %arg3[%c14] : memref<15xf32, #tpu.memory_space<smem>>
    %c14_30 = arith.constant 14 : index
    %142 = memref.load %arg1[%c14_30] : memref<15xf32, #tpu.memory_space<smem>>
    %143 = vector.broadcast %142 : f32 to vector<8x128xf32>
    %144 = arith.mulf %143, %0 : vector<8x128xf32>
    %c14_31 = arith.constant 14 : index
    %145 = memref.load %arg2[%c14_31] : memref<15xf32, #tpu.memory_space<smem>>
    %146 = vector.broadcast %145 : f32 to vector<8x128xf32>
    %147 = arith.addf %144, %146 : vector<8x128xf32>
    %148 = math.tanh %147 : vector<8x128xf32>
    %149 = vector.broadcast %141 : f32 to vector<8x128xf32>
    %150 = arith.mulf %149, %148 : vector<8x128xf32>
    %151 = arith.addf %10, %20 : vector<8x128xf32>
    %152 = arith.addf %30, %40 : vector<8x128xf32>
    %153 = arith.addf %50, %60 : vector<8x128xf32>
    %154 = arith.addf %70, %80 : vector<8x128xf32>
    %155 = arith.addf %90, %100 : vector<8x128xf32>
    %156 = arith.addf %110, %120 : vector<8x128xf32>
    %157 = arith.addf %130, %140 : vector<8x128xf32>
    %158 = arith.addf %151, %152 : vector<8x128xf32>
    %159 = arith.addf %153, %154 : vector<8x128xf32>
    %160 = arith.addf %155, %156 : vector<8x128xf32>
    %161 = arith.addf %157, %150 : vector<8x128xf32>
    %162 = arith.addf %158, %159 : vector<8x128xf32>
    %163 = arith.addf %160, %161 : vector<8x128xf32>
    %164 = arith.addf %162, %163 : vector<8x128xf32>
    %c0_32 = arith.constant 0 : index
    %165 = memref.load %arg4[%c0_32] : memref<1xf32, #tpu.memory_space<smem>>
    %166 = vector.broadcast %165 : f32 to vector<8x128xf32>
    %167 = arith.addf %164, %166 : vector<8x128xf32>
    %c0_33 = arith.constant 0 : index
    %c0_34 = arith.constant 0 : index
    %168 = vector.load %arg6[%c0_33, %c0_34] : memref<8x128xf32, #tpu.memory_space<vmem>>, vector<8x128xf32>
    tpu.vector_store %arg6[%c0_33, %c0_34], %167 {strides = array<i32>} : memref<8x128xf32, #tpu.memory_space<vmem>>, vector<8x128xf32>,
    return
  }
  func.func @transform_0(%arg0: i32) -> i32 {
    %c0_i32 = arith.constant 0 : i32
    %c0_i32_0 = arith.constant 0 : i32
    return %c0_i32 : i32
  }
  func.func @transform_1(%arg0: i32) -> i32 {
    %c0_i32 = arith.constant 0 : i32
    %c0_i32_0 = arith.constant 0 : i32
    return %c0_i32 : i32
  }
  func.func @transform_2(%arg0: i32) -> i32 {
    %c0_i32 = arith.constant 0 : i32
    %c0_i32_0 = arith.constant 0 : i32
    return %c0_i32 : i32
  }
  func.func @transform_3(%arg0: i32) -> i32 {
    %c0_i32 = arith.constant 0 : i32
    %c0_i32_0 = arith.constant 0 : i32
    return %c0_i32 : i32
  }
  func.func @transform_4(%arg0: i32) -> (i32, i32) {
    %c0_i32 = arith.constant 0 : i32
    %c0_i32_0 = arith.constant 0 : i32
    return %arg0, %c0_i32 : i32, i32
  }
  func.func @transform_5(%arg0: i32) -> (i32, i32) {
    %c0_i32 = arith.constant 0 : i32
    %c0_i32_0 = arith.constant 0 : i32
    return %arg0, %c0_i32 : i32, i32
  }
}

</mosaic_0001>

<bundles_post_ra>
// kernel: net_forward.1
= control target key start
LH: loop header
LB: loop body
LE: loop exit
PB: predicated region body
PF: predicated region fallthrough
CT: control target
= control target key end

     0   :  { %11 = vsyncpa [#allocation4], 0  ;;  %s508_s0 = inlined_call_operand.vmem [shape: f32[15], index: 0, kind: input, shape index: {}]   ;;  %s509_s1 = inlined_call_operand.vmem [shape: f32[15], index: 1, kind: input, shape index: {}]   ;;  %s510_s2 = inlined_call_operand.vmem [shape: f32[15], index: 2, kind: input, shape index: {}]   ;;  %s511_s3 = inlined_call_operand.<no memory space> [shape: f32[1], index: 3, kind: input, shape index: {}]   ;;  %s512_s4 = inlined_call_operand.vmem [shape: f32[8,128], index: 4, kind: input, shape index: {}]   ;;  %s513_s5 = inlined_call_operand.vmem [shape: f32[8,128], index: 5, kind: output, shape index: {}]  }
   0x1   :  { %12 = vsyncpa [#allocation6], 0  ;;  %s29_s20 = sshll.u32 %s509_s1, 4  ;;  %s19_s23 = sshll.u32 %s508_s0, 4  ;;  %s30_s20 = int_to_ptr.vmem [resolvable:$true] %s29_s20  ;;  %s20_s23 = int_to_ptr.vmem [resolvable:$true] %s19_s23 }
   0x2   :  { %s307_s24 = scalar_lea.vmem %s30_s20, 16  ;;  %p312_p1 = scmp.lt.s32.totalorder %s30_s20, %s30_s20 }
   0x3   :  { %p308_p0 = scmp.ne.s32.totalorder %s30_s20, %s307_s24  ;;  %p313_p2 = scmp.lt.s32.totalorder %s307_s24, %s307_s24 }
   0x5   :  { %p314_p3 = por %p313_p2, %p312_p1 }
   0x7   :  { %p315_p4 = pnand %p314_p3, %p308_p0 }
   0x9   :  { %318 = shalt.err (!%p315_p4)
}
   0xa   :  { %s347_s25 = smov [#allocation5]   ;;  %s319_s26 = scalar_lea.vmem %s20_s23, 16 }
   0xb   :  { %32 = dma.vmem_to_smem %s30_s20, 16, %s347_s25, [#allocation6]  }
   0xc   :  { %p320_p5 = scmp.ne.s32.totalorder %s20_s23, %s319_s26  ;;  %p324_p6 = scmp.lt.s32.totalorder %s20_s23, %s20_s23 }
   0xd   :  { %p325_p7 = scmp.lt.s32.totalorder %s319_s26, %s319_s26 }
   0xf   :  { %p326_p8 = por %p325_p7, %p324_p6 }
  0x11   :  { %p327_p9 = pnand %p326_p8, %p320_p5 }
  0x13   :  { %330 = shalt.err (!%p327_p9)
}
  0x14   :  { %s348_s1 = smov [#allocation3]   ;;  %s39_s28 = sshll.u32 %s510_s2, 4  ;;  %s40_s28 = int_to_ptr.vmem [resolvable:$true] %s39_s28 }
  0x15   :  { %22 = dma.vmem_to_smem %s20_s23, 16, %s348_s1, [#allocation4]  }
  0x16   :  { %s331_s29 = scalar_lea.vmem %s40_s28, 16  ;;  %p336_p11 = scmp.lt.s32.totalorder %s40_s28, %s40_s28 }
  0x17   :  { %p332_p10 = scmp.ne.s32.totalorder %s40_s28, %s331_s29  ;;  %p337_p12 = scmp.lt.s32.totalorder %s331_s29, %s331_s29 }
  0x19   :  { %p338_p13 = por %p337_p12, %p336_p11 }
  0x1b   :  { %p339_p0 = pnand %p338_p13, %p332_p10 }
  0x1d   :  { %342 = shalt.err (!%p339_p0)
}
  0x1e   :  { %s349_s30 = smov [#allocation7]  }
  0x1f   :  { %42 = dma.vmem_to_smem %s40_s28, 16, %s349_s30, [#allocation6]  }
  0x20   :  { %343 = dma.done.wait [#allocation4], 16  }
  0x21   :  { %344 = vsyncadd [#allocation4], 4294967280 }
  0x22   :  { %345 = dma.done.wait [#allocation6], 32  }
  0x23   :  { %346 = vsyncadd [#allocation6], 4294967264 }
  0x24   :  { %56 = sfence }
  0x25   :  { %s389_s6 = sld [smem:[#allocation7]]  ;;  %v412_v0 = vld [vmem:[%s512_s4] sm:$0xff] }
  0x26   :  { %s59_s7 = sld [smem:[#allocation3]] }
  0x27   :  { %s391_s8 = sld [smem:[#allocation5]] }
  0x28   :  { %s393_s2 = sld [smem:[#allocation7 + $0x1]] }
  0x29   :  { %s233_s9 = sld [smem:[#allocation3 + $0x1]] }
  0x2a   :  { %s395_s10 = sld [smem:[#allocation5 + $0x1]] }
  0x2b   :  { %s236_s11 = sld [smem:[#allocation3 + $0x2]] }
  0x2c   :  { %s397_s12 = sld [smem:[#allocation5 + $0x2]]  ;;  %v60_v1 = vstv %s59_s7 }
  0x2d   :  { %s239_s13 = sld [smem:[#allocation3 + $0x3]]  ;;  %v61_v3 = vmul.f32 %v60_v1, %v412_v0  ;;  %v63_v5 = vstv %s391_s8 }
  0x2e   :  { %s399_s14 = sld [smem:[#allocation5 + $0x3]] }
  0x2f   :  { %s401_s15 = sld [smem:[#allocation3 + $0x4]]  ;;  %v70_v2 = vstv %s233_s9  ;;  %v64_v12 = vadd.f32 %v63_v5, %v61_v3  ;;  %v66_v5 = vstv %s389_s6 }
  0x30   :  { %s403_s16 = sld [smem:[#allocation5 + $0x4]]  ;;  %v71_v7 = vmul.f32 %v70_v2, %v412_v0  ;;  %v73_v9 = vstv %s395_s10 }
  0x31   :  { %s405_s17 = sld [smem:[#allocation3 + $0x5]]  ;;  %v80_v4 = vstv %s236_s11  ;;  %277 = vtanh.f32 %v64_v12 }
  0x32   :  { %s407_s18 = sld [smem:[#allocation3 + $0x6]]  ;;  %v81_v10 = vmul.f32 %v80_v4, %v412_v0  ;;  %v83_v13 = vstv %s397_s12  ;;  %v74_v19 = vadd.f32 %v73_v9, %v71_v7 }
  0x33   :  { %s414_s21 = sld [smem:[#allocation3 + $0x7]]  ;;  %v90_v6 = vstv %s239_s13 }
  0x34   :  { %s416_s22 = sld [smem:[#allocation5 + $0x5]]  ;;  %v91_v14 = vmul.f32 %v90_v6, %v412_v0  ;;  %v93_v16 = vstv %s399_s14  ;;  %v84_v23 = vadd.f32 %v83_v13, %v81_v10  ;;  %279 = vtanh.f32 %v74_v19 }
  0x35   :  { %s418_s23 = sld [smem:[#allocation5 + $0x6]]  ;;  %v100_v8 = vstv %s401_s15  ;;  %v76_v6 = vstv %s393_s2 }
  0x36   :  { %s421_s24 = sld [smem:[#allocation3 + $0x8]]  ;;  %v101_v17 = vmul.f32 %v100_v8, %v412_v0  ;;  %v103_v20 = vstv %s403_s16  ;;  %v94_v26 = vadd.f32 %v93_v16, %v91_v14  ;;  %281 = vtanh.f32 %v84_v23 }
  0x37   :  { %s424_s4 = sld [smem:[#allocation5 + $0x7]]  ;;  %v110_v11 = vstv %s405_s17 }
  0x38   :  { %s428_s25 = sld [smem:[#allocation5 + $0x8]]  ;;  %v120_v15 = vstv %s407_s18  ;;  %v111_v21 = vmul.f32 %v110_v11, %v412_v0  ;;  %v104_v29 = vadd.f32 %v103_v20, %v101_v17  ;;  %283 = vtanh.f32 %v94_v26 }
  0x39   :  { %s433_s26 = sld [smem:[#allocation3 + $0x9]]  ;;  %v130_v18 = vstv %s414_s21  ;;  %v121_v25 = vmul.f32 %v120_v15, %v412_v0 }
  0x3a   :  { %s438_s1 = sld [smem:[#allocation5 + $0x9]]  ;;  %v113_v24 = vstv %s416_s22  ;;  %v131_v28 = vmul.f32 %v130_v18, %v412_v0  ;;  %285 = vtanh.f32 %v104_v29 }
  0x3b   :  { %s440_s0 = sld [smem:[#allocation7 + $0x2]]  ;;  %v123_v27 = vstv %s418_s23  ;;  %v114_v33 = vadd.f32 %v113_v24, %v111_v21 }
  0x3c   :  { %v140_v22 = vstv %s421_s24  ;;  %s260_s27 = sld [smem:[#allocation3 + $0xa]]  ;;  %v124_v36 = vadd.f32 %v123_v27, %v121_v25 }
  0x3d   :  { %s450_s28 = sld [smem:[#allocation5 + $0xa]]  ;;  %v133_v30 = vstv %s424_s4  ;;  %v141_v31 = vmul.f32 %v140_v22, %v412_v0  ;;  %287 = vtanh.f32 %v114_v33 }
  0x3e   :  { %s452_s29 = sld [smem:[#allocation7 + $0x3]]  ;;  %v143_v34 = vstv %s428_s25  ;;  %v134_v38 = vadd.f32 %v133_v30, %v131_v28  ;;  %289 = vtanh.f32 %v124_v36  ;;  %v278_v52 = vpop.eup %277 }
  0x3f   :  { %v150_v32 = vstv %s433_s26  ;;  %s263_s30 = sld [smem:[#allocation3 + $0xb]]  ;;  %v144_v40 = vadd.f32 %v143_v34, %v141_v31  ;;  %v67_v15 = vmul.f32 %v278_v52, %v66_v5 }
  0x40   :  { %v151_v35 = vmul.f32 %v150_v32, %v412_v0  ;;  %s264_s7 = sld [smem:[#allocation5 + $0xb]]  ;;  %v153_v37 = vstv %s438_s1  ;;  %291 = vtanh.f32 %v134_v38 }
  0x41   :  { %s461_s8 = sld [smem:[#allocation7 + $0x4]]  ;;  %293 = vtanh.f32 %v144_v40  ;;  %v280_v57 = vpop.eup %279  ;;  %v86_v7 = vstv %s440_s0 }
  0x42   :  { %v160_v39 = vstv %s260_s27  ;;  %s266_s9 = sld [smem:[#allocation3 + $0xc]]  ;;  %v154_v43 = vadd.f32 %v153_v37, %v151_v35  ;;  %v77_v16 = vmul.f32 %v280_v57, %v76_v6 }
  0x43   :  { %v161_v41 = vmul.f32 %v160_v39, %v412_v0  ;;  %v163_v42 = vstv %s450_s28  ;;  %s267_s10 = sld [smem:[#allocation5 + $0xc]]  ;;  %v282_v58 = vpop.eup %281 }
  0x44   :  { %s466_s11 = sld [smem:[#allocation7 + $0x5]]  ;;  %295 = vtanh.f32 %v154_v43  ;;  %v96_v9 = vstv %s452_s29  ;;  %v87_v17 = vmul.f32 %v282_v58, %v86_v7  ;;  %v208_v35 = vadd.f32 %v77_v16, %v67_v15 }
  0x45   :  { %v164_v44 = vadd.f32 %v163_v42, %v161_v41  ;;  %v170_v45 = vstv %s263_s30  ;;  %s269_s12 = sld [smem:[#allocation3 + $0xd]]  ;;  %v284_v61 = vpop.eup %283 }
  0x46   :  { %v171_v46 = vmul.f32 %v170_v45, %v412_v0  ;;  %v173_v47 = vstv %s264_s7  ;;  %s270_s13 = sld [smem:[#allocation5 + $0xd]]  ;;  %v97_v20 = vmul.f32 %v284_v61, %v96_v9 }
  0x47   :  { %s469_s14 = sld [smem:[#allocation7 + $0x6]]  ;;  %297 = vtanh.f32 %v164_v44  ;;  %v286_v1 = vpop.eup %285  ;;  %v106_v10 = vstv %s461_s8 }
  0x48   :  { %v174_v48 = vadd.f32 %v173_v47, %v171_v46  ;;  %v180_v49 = vstv %s266_s9  ;;  %s272_s15 = sld [smem:[#allocation3 + $0xe]]  ;;  %v107_v25 = vmul.f32 %v286_v1, %v106_v10  ;;  %v209_v37 = vadd.f32 %v97_v20, %v87_v17 }
  0x49   :  { %v181_v50 = vmul.f32 %v180_v49, %v412_v0  ;;  %v183_v51 = vstv %s267_s10  ;;  %s273_s16 = sld [smem:[#allocation5 + $0xe]] }
  0x4a   :  { %s472_s17 = sld [smem:[#allocation7 + $0x7]]  ;;  %299 = vtanh.f32 %v174_v48  ;;  %v288_v2 = vpop.eup %287  ;;  %v116_v11 = vstv %s466_s11  ;;  %v215_v46 = vadd.f32 %v209_v37, %v208_v35 }
  0x4b   :  { %s474_s18 = sld [smem:[#allocation7 + $0x8]]  ;;  %v184_v53 = vadd.f32 %v183_v51, %v181_v50  ;;  %v190_v54 = vstv %s269_s12  ;;  %v290_v4 = vpop.eup %289  ;;  %v117_v26 = vmul.f32 %v288_v2, %v116_v11 }
  0x4c   :  { %s476_s19 = sld [smem:[#allocation7 + $0x9]]  ;;  %v191_v55 = vmul.f32 %v190_v54, %v412_v0  ;;  %v193_v56 = vstv %s270_s13 }
  0x4d   :  { %s479_s20 = sld [smem:[#allocation7 + $0xa]]  ;;  %301 = vtanh.f32 %v184_v53  ;;  %v292_v8 = vpop.eup %291  ;;  %v126_v12 = vstv %s469_s14  ;;  %v210_v38 = vadd.f32 %v117_v26, %v107_v25 }
  0x4e   :  { %s481_s21 = sld [smem:[#allocation7 + $0xb]]  ;;  %v194_v59 = vadd.f32 %v193_v56, %v191_v55  ;;  %v200_v60 = vstv %s272_s15  ;;  %v127_v27 = vmul.f32 %v290_v4, %v126_v12  ;;  %v223_v55 = vstv %s511_s3 }
  0x4f   :  { %v201_v62 = vmul.f32 %v200_v60, %v412_v0  ;;  %v203_v63 = vstv %s273_s16  ;;  %s484_s22 = sld [smem:[#allocation7 + $0xc]]  ;;  %v294_v0 = vpop.eup %293 }
  0x50   :  { %303 = vtanh.f32 %v194_v59  ;;  %s490_s23 = sld [smem:[#allocation7 + $0xd]]  ;;  %v136_v13 = vstv %s472_s17 }
  0x51   :  { %v204_v3 = vadd.f32 %v203_v63, %v201_v62  ;;  %v296_v14 = vpop.eup %295  ;;  %v146_v18 = vstv %s474_s18  ;;  %s271_s6 = sld [smem:[#allocation7 + $0xe]]  ;;  %v137_v28 = vmul.f32 %v292_v8, %v136_v13 }
  0x52   :  { %v156_v21 = vstv %s476_s19  ;;  %v147_v30 = vmul.f32 %v294_v0, %v146_v18 }
  0x53   :  { %305 = vtanh.f32 %v204_v3  ;;  %v166_v22 = vstv %s479_s20  ;;  %v157_v31 = vmul.f32 %v296_v14, %v156_v21  ;;  %v211_v39 = vadd.f32 %v137_v28, %v127_v27 }
  0x54   :  { %v298_v19 = vpop.eup %297  ;;  %v176_v23 = vstv %s481_s21 }
  0x55   :  { %v186_v29 = vstv %s484_s22  ;;  %v167_v32 = vmul.f32 %v298_v19, %v166_v22  ;;  %v212_v42 = vadd.f32 %v157_v31, %v147_v30  ;;  %v216_v47 = vadd.f32 %v211_v39, %v210_v38 }
  0x56   :  { %v196_v36 = vstv %s490_s23 }
  0x57   :  { %v300_v24 = vpop.eup %299  ;;  %v206_v45 = vstv %s271_s6  ;;  %v219_v53 = vadd.f32 %v216_v47, %v215_v46 }
  0x58   :  { %v177_v33 = vmul.f32 %v300_v24, %v176_v23 }
  0x5a   :  { %v302_v34 = vpop.eup %301  ;;  %v213_v43 = vadd.f32 %v177_v33, %v167_v32 }
  0x5b   :  { %v187_v40 = vmul.f32 %v302_v34, %v186_v29 }
  0x5c   :  { %v217_v51 = vadd.f32 %v213_v43, %v212_v42 }
  0x5d   :  { %v304_v41 = vpop.eup %303 }
  0x5e   :  { %v197_v44 = vmul.f32 %v304_v41, %v196_v36 }
  0x60   :  { %v306_v48 = vpop.eup %305  ;;  %v214_v49 = vadd.f32 %v197_v44, %v187_v40 }
  0x61   :  { %v207_v50 = vmul.f32 %v306_v48, %v206_v45 }
  0x63   :  { %v218_v52 = vadd.f32 %v214_v49, %v207_v50 }
  0x65   :  { %v220_v54 = vadd.f32 %v218_v52, %v217_v51 }
  0x67   :  { %v221_v56 = vadd.f32 %v220_v54, %v219_v53 }
  0x69   :  { %v224_v57 = vadd.f32 %v223_v55, %v221_v56 }
  0x6b   :  { %225 = vst [vmem:[%s513_s5] sm:$0xff] %v224_v57 }
  0x6c   :  { %230 = vsyncpa [#allocation4], 1 }
  0x6d   :  { %231 = vsyncpa [#allocation6], 1 }

</bundles_post_ra>
